<compile_context>
chip_gen: v5e
topology: v5e:2x2
jax: 0.10.0
libtpu: 0.0.40
codegen_flags: <defaults>
</compile_context>

<pallas_src>
import jax
import jax.numpy as jnp
from jax.experimental import pallas as pl
from jax.experimental.pallas import tpu as pltpu


def _round_up(v, m):
    return ((v + m - 1) // m) * m


def _vmem_limit_bytes():
    # Raise the scoped-VMEM limit above the per-generation defaults
    # (16 MiB v5e / 32 MiB v6e,v7x) while keeping headroom below physical
    # (128 MiB v5e/v6e, 64 MiB v7x per TensorCore).
    try:
        cap = pltpu.get_tpu_info().vmem_capacity_bytes
    except Exception:
        cap = 64 * 1024 * 1024  # conservative: v7x physical VMEM per TensorCore
    return (3 * cap) // 4


def _fused_step_bytes(G, tn, Np, Fp):
    """Rough per-grid-step VMEM footprint of the fused kernel."""
    a_tile = G * tn * Np * 2        # bf16 adjacency row-tile
    x_slab = G * Np * Fp * 4        # f32 feature slab (resident across rr)
    w_tile = Fp * Fp * 2            # bf16 weight (resident, still dbl-allocated)
    b_tile = Fp * 4                 # f32 bias
    o_tile = G * tn * Fp * 4        # f32 output row-tile
    ux_scr = G * Np * Fp * 2        # bf16 ux scratch (single buffer)
    temps = 3 * (G * tn * Np * 4)   # a / exp / softmax f32 temporaries
    temps += G * tn * Np * 2        # bf16 softmax(A) MXU operand
    temps += G * tn * Fp * 4        # f32 msg einsum result
    temps += G * Np * Fp * 4        # f32 ux accumulator at row-tile 0
    return 2 * (a_tile + x_slab + w_tile + b_tile + o_tile) + ux_scr + temps


def _gconv_fused_kernel(a_ref, x_ref, wt_ref, b_ref, o_ref, ux_ref):
    # a_ref : (G, tn, Np) bf16   adjacency row-tile
    # x_ref : (G, Np, Fp) f32    full feature slab for the G graphs (resident over rr)
    # wt_ref: (Fp, Fp)    bf16   W.T, resident across the whole grid
    # b_ref : (1, Fp)     f32
    # o_ref : (G, tn, Fp) f32    output row-tile
    # ux_ref: (G, Np, Fp) bf16   VMEM scratch, recomputed at row-tile 0 of each graph-block
    rr = pl.program_id(1)
    g, npad, fp = x_ref.shape
    tn = a_ref.shape[1]

    # ---- fused linear + ReLU: ux = relu(x @ W.T + b), once per graph-block ----
    @pl.when(rr == 0)
    def _():
        # bf16 cast happens on the VPU in-VMEM (x is read from HBM as f32 only once).
        xg = x_ref[...].astype(jnp.bfloat16).reshape(g * npad, fp)
        acc = jnp.dot(xg, wt_ref[...], preferred_element_type=jnp.float32)
        acc = jnp.maximum(acc + b_ref[...], 0.0)
        ux_ref[...] = acc.astype(jnp.bfloat16).reshape(g, npad, fp)

    # ---- row-tiled softmax(A) over full (padded, -1e9 filled) lane dim ----
    a = a_ref[...].astype(jnp.float32)
    m = jnp.max(a, axis=-1, keepdims=True)
    e = jnp.exp(a - m)
    # approx reciprocal lowers to the EUP slot -> effectively free next to exp
    a_sm = e * pl.reciprocal(jnp.sum(e, axis=-1, keepdims=True), approx=True)

    # ---- msg = softmax(A) @ ux : bf16 MXU operands, f32 accumulation ----
    msg = jnp.einsum(
        "gnm,gmf->gnf",
        a_sm.astype(jnp.bfloat16),
        ux_ref[...],
        preferred_element_type=jnp.float32,
    )

    # ---- residual: slice the matching rows out of the resident x slab ----
    row0 = pl.multiple_of(rr * tn, tn)
    o_ref[...] = x_ref[:, pl.ds(row0, tn), :] + msg


def gconv_forward(A, x, W, b, x_mask=None, norm=True):
    """A: (B,N,N), x: (B,N,F), W: (F_out,F_in), b: (F_out,). Returns (B,N,F) f32."""
    if not norm:
        # TODO(synk): norm=False path (no softmax on A) would need a kernel variant.
        raise NotImplementedError("only norm=True is lowered to Pallas")

    B, N, F = x.shape
    A = A.astype(jnp.float32)
    if x_mask is not None:
        A = jnp.where(x_mask, -1.0e9, A)  # masked_fill(x_mask, -1e9)

    # ---- layout plumbing: 128-align both the node and feature dims ----------
    # Np is A's lane dim and the MXU contraction K; Fp is the lane dim of x/ux/out.
    Np = _round_up(N, 128)
    Fp = _round_up(F, 128)
    # A: pad with -1e9 (real-row softmax ignores padded columns) and stream bf16;
    # the cast rides along with the pad pass instead of being a separate XLA op.
    A_p = jnp.pad(
        A.astype(jnp.bfloat16),
        ((0, 0), (0, Np - N), (0, Np - N)),
        constant_values=-1.0e9,
    )
    # x stays f32 in HBM; the kernel casts to bf16 in-VMEM for the MXU.
    x_p = jnp.pad(x.astype(jnp.float32), ((0, 0), (0, Np - N), (0, Fp - F)))
    # Weight-normalized Linear weight, transposed + padded + bf16 (tiny parameter).
    # TODO(synk): for very large Fp (>= 2048) tile the weight over output features
    # so the resident bf16 block stays within v7x's 64 MiB VMEM.
    wt_bf16 = jnp.pad(W.astype(jnp.float32), ((0, Fp - F), (0, Fp - F))).T.astype(jnp.bfloat16)
    b_p = jnp.pad(b.astype(jnp.float32), (0, Fp - F)).reshape(1, Fp)

    vmem_limit = _vmem_limit_bytes()
    budget = vmem_limit // 2  # headroom for Mosaic internal scratch / spills

    # ---- tile selection: grow tn (MXU M) first, keep G small ----------------
    tn = 128
    for cand in (512, 256):
        if Np % cand == 0 and _fused_step_bytes(1, cand, Np, Fp) <= budget:
            tn = cand
            break

    G = 1
    for cand in (4, 2):
        if B % cand != 0:
            continue
        if B // cand < 2:                      # keep >=2 batch steps for megacore
            continue
        if (B // cand) * (Np // tn) < 4:       # keep the pipeline alive
            continue
        if _fused_step_bytes(cand, tn, Np, Fp) <= budget:
            G = cand
            break

    grid_spec = pltpu.PrefetchScalarGridSpec(
        num_scalar_prefetch=0,
        grid=(B // G, Np // tn),
        in_specs=[
            pl.BlockSpec((G, tn, Np), lambda bb, rr: (bb, rr, 0)),   # A row-tile
            pl.BlockSpec((G, Np, Fp), lambda bb, rr: (bb, 0, 0)),    # x slab (resident over rr)
            pl.BlockSpec((Fp, Fp), lambda bb, rr: (0, 0)),           # W.T (resident)
            pl.BlockSpec((1, Fp), lambda bb, rr: (0, 0)),            # bias
        ],
        out_specs=pl.BlockSpec((G, tn, Fp), lambda bb, rr: (bb, rr, 0)),
        scratch_shapes=[pltpu.VMEM((G, Np, Fp), jnp.bfloat16)],      # fused ux slab
    )

    out_p = pl.pallas_call(
        _gconv_fused_kernel,
        out_shape=jax.ShapeDtypeStruct((B, Np, Fp), jnp.float32),
        grid_spec=grid_spec,
        compiler_params=pltpu.CompilerParams(
            # batch axis parallel (v7x megacore shards it; ux slab fetched once per bb),
            # row axis arbitrary (the ux scratch carries state across rr).
            dimension_semantics=("parallel", "arbitrary"),
            vmem_limit_bytes=vmem_limit,
        ),
    )(A_p, x_p, wt_bf16, b_p)

    return out_p[:, :N, :F]


def make_weightnorm_params(key, in_features, out_features):
    """Deterministic weight_norm(nn.Linear) params: W = g * v / ||v||_row, plus bias."""
    kv, kg, kb = jax.random.split(key, 3)
    bound = 1.0 / jnp.sqrt(in_features)
    v = jax.random.uniform(kv, (out_features, in_features), jnp.float32, -bound, bound)
    g = jnp.linalg.norm(v, axis=1) * (1.0 + 0.1 * jax.random.normal(kg, (out_features,)))
    b = jax.random.uniform(kb, (out_features,), jnp.float32, -bound, bound)
    W = g[:, None] * v / jnp.linalg.norm(v, axis=1, keepdims=True)
    return W, b


def gconv_reference(A, x, W, b):
    A_sm = jax.nn.softmax(A.astype(jnp.float32), axis=-1)
    ux = jax.nn.relu(jnp.einsum("bnf,of->bno", x, W) + b)
    return x + jnp.einsum("bnm,bmo->bno", A_sm, ux)


if __name__ == "__main__":
    key = jax.random.PRNGKey(0)
    k_a, k_x, k_w = jax.random.split(key, 3)

    B, N, F = 2, 8, 32  # batch, nodes, features (in_features == out_features)
    A = jax.random.normal(k_a, (B, N, N), jnp.float32)
    x = jax.random.normal(k_x, (B, N, F), jnp.float32)
    W, bias = make_weightnorm_params(k_w, F, F)

    out = jax.block_until_ready(gconv_forward(A, x, W, bias))
    ref = gconv_reference(A, x, W, bias)

    assert out.shape == (B, N, F)
    # bf16 A / bf16 MXU operands (f32 accumulate) + approx softmax reciprocal:
    # compare against the f32 reference at bf16-level tolerance.
    assert jnp.allclose(out, ref, atol=5e-2, rtol=5e-2), float(jnp.max(jnp.abs(out - ref)))

    print("KERNEL_OK")
</pallas_src>

<mosaic_0001>
module attributes {stable_mosaic.version = 11 : i64} {
  func.func @_gconv_fused_kernel(%arg0: i32, %arg1: i32, %arg2: memref<1x128x128xbf16, #tpu.memory_space<vmem>>, %arg3: memref<1x128x128xf32, #tpu.memory_space<vmem>>, %arg4: memref<128x128xbf16, #tpu.memory_space<vmem>>, %arg5: memref<1x128xf32, #tpu.memory_space<vmem>>, %arg6: memref<1x128x128xf32, #tpu.memory_space<vmem>>, %arg7: memref<1x128x128xbf16, #tpu.memory_space<vmem>>) attributes {dimension_semantics = [#tpu.dimension_semantics<parallel>, #tpu.dimension_semantics<arbitrary>], iteration_bounds = array<i64: 2, 1>, scalar_prefetch = 0 : i64, scratch_operands = 1 : i64, tpu.core_type = #tpu.core_type<tc>, window_params = [{transform_indices = @transform_0, window_bounds = array<i64: 1, 128, 128>}, {transform_indices = @transform_1, window_bounds = array<i64: 1, 128, 128>}, {pipeline_mode = #tpu.pipeline_mode<synchronous>, transform_indices = @transform_2, window_bounds = array<i64: 128, 128>}, {pipeline_mode = #tpu.pipeline_mode<synchronous>, transform_indices = @transform_3, window_bounds = array<i64: 1, 128>}, {transform_indices = @transform_4, window_bounds = array<i64: 1, 128, 128>}]} {
    %c0_i32 = arith.constant 0 : i32
    %0 = arith.cmpi eq, %arg1, %c0_i32 : i32
    %1 = arith.extui %0 : i1 to i32
    %c0_i32_0 = arith.constant 0 : i32
    %2 = arith.cmpi ne, %1, %c0_i32_0 : i32
    scf.if %2 {
      %c0_13 = arith.constant 0 : index
      %c0_14 = arith.constant 0 : index
      %c0_15 = arith.constant 0 : index
      %24 = vector.load %arg3[%c0_13, %c0_14, %c0_15] : memref<1x128x128xf32, #tpu.memory_space<vmem>>, vector<1x128x128xf32>
      %25 = arith.truncf %24 : vector<1x128x128xf32> to vector<1x128x128xbf16>
      %26 = vector.shape_cast %25 : vector<1x128x128xbf16> to vector<128x128xbf16>
      %c0_16 = arith.constant 0 : index
      %c0_17 = arith.constant 0 : index
      %27 = vector.load %arg4[%c0_16, %c0_17] : memref<128x128xbf16, #tpu.memory_space<vmem>>, vector<128x128xbf16>
      %cst_18 = arith.constant dense<0.000000e+00> : vector<128x128xf32>
      %28 = tpu.matmul %26, %27, %cst_18 {dimension_numbers = #tpu.dot_dimension_numbers<[1], [0], [0], [1], [0, 0, 1, 1], [], []>} : vector<128x128xbf16>, vector<128x128xbf16>, vector<128x128xf32> -> vector<128x128xf32>
      %c0_19 = arith.constant 0 : index
      %c0_20 = arith.constant 0 : index
      %29 = vector.load %arg5[%c0_19, %c0_20] : memref<1x128xf32, #tpu.memory_space<vmem>>, vector<1x128xf32>
      %30 = vector.broadcast %29 : vector<1x128xf32> to vector<128x128xf32>
      %31 = arith.addf %28, %30 : vector<128x128xf32>
      %cst_21 = arith.constant 0.000000e+00 : f32
      %32 = vector.broadcast %cst_21 : f32 to vector<128x128xf32>
      %33 = arith.maximumf %31, %32 : vector<128x128xf32>
      %34 = arith.truncf %33 : vector<128x128xf32> to vector<128x128xbf16>
      %35 = vector.shape_cast %34 : vector<128x128xbf16> to vector<1x128x128xbf16>
      %c0_22 = arith.constant 0 : index
      %c0_23 = arith.constant 0 : index
      %c0_24 = arith.constant 0 : index
      %36 = vector.load %arg7[%c0_22, %c0_23, %c0_24] : memref<1x128x128xbf16, #tpu.memory_space<vmem>>, vector<1x128x128xbf16>
      tpu.vector_store %arg7[%c0_22, %c0_23, %c0_24], %35 {strides = array<i32>} : memref<1x128x128xbf16, #tpu.memory_space<vmem>>, vector<1x128x128xbf16>,
    } else {
    }
    %c0 = arith.constant 0 : index
    %c0_1 = arith.constant 0 : index
    %c0_2 = arith.constant 0 : index
    %3 = vector.load %arg2[%c0, %c0_1, %c0_2] : memref<1x128x128xbf16, #tpu.memory_space<vmem>>, vector<1x128x128xbf16>
    %4 = arith.extf %3 : vector<1x128x128xbf16> to vector<1x128x128xf32>
    %cst = arith.constant dense<0xFF800000> : vector<1x128xf32>
    %5 = vector.multi_reduction <maximumf>, %4, %cst [2] : vector<1x128x128xf32> to vector<1x128xf32>
    %6 = vector.shape_cast %5 : vector<1x128xf32> to vector<1x128x1xf32>
    %7 = vector.broadcast %6 : vector<1x128x1xf32> to vector<1x128x128xf32>
    %8 = arith.subf %4, %7 : vector<1x128x128xf32>
    %9 = math.exp %8 : vector<1x128x128xf32>
    %cst_3 = arith.constant dense<0.000000e+00> : vector<1x128xf32>
    %10 = vector.multi_reduction <add>, %9, %cst_3 [2] : vector<1x128x128xf32> to vector<1x128xf32>
    %11 = vector.shape_cast %10 : vector<1x128xf32> to vector<1x128x1xf32>
    %12 = tpu.reciprocal %11 {approx = true} : vector<1x128x1xf32> -> vector<1x128x1xf32>
    %13 = vector.broadcast %12 : vector<1x128x1xf32> to vector<1x128x128xf32>
    %14 = arith.mulf %9, %13 : vector<1x128x128xf32>
    %15 = arith.truncf %14 : vector<1x128x128xf32> to vector<1x128x128xbf16>
    %c0_4 = arith.constant 0 : index
    %c0_5 = arith.constant 0 : index
    %c0_6 = arith.constant 0 : index
    %16 = vector.load %arg7[%c0_4, %c0_5, %c0_6] : memref<1x128x128xbf16, #tpu.memory_space<vmem>>, vector<1x128x128xbf16>
    "tpu.trace_start"() <{level = 10 : i32, message = "gnm,gmf->gnf"}> : () -> ()
    %cst_7 = arith.constant dense<0.000000e+00> : vector<1x128x128xf32>
    %17 = tpu.matmul %15, %16, %cst_7 {dimension_numbers = #tpu.dot_dimension_numbers<[2], [1], [1], [2], [0, 0, 0, 1, 1, 2], [0], [0]>} : vector<1x128x128xbf16>, vector<1x128x128xbf16>, vector<1x128x128xf32> -> vector<1x128x128xf32>
    "tpu.trace_stop"() : () -> ()
    %c128_i32 = arith.constant 128 : i32
    %18 = arith.muli %arg1, %c128_i32 : i32
    %19 = tpu.assume_multiple %18, 128 : i32
    %c0_8 = arith.constant 0 : index
    %20 = arith.index_cast %19 : i32 to index
    %c0_9 = arith.constant 0 : index
    %21 = vector.load %arg3[%c0_8, %20, %c0_9] : memref<1x128x128xf32, #tpu.memory_space<vmem>>, vector<1x128x128xf32>
    %22 = arith.addf %21, %17 : vector<1x128x128xf32>
    %c0_10 = arith.constant 0 : index
    %c0_11 = arith.constant 0 : index
    %c0_12 = arith.constant 0 : index
    %23 = vector.load %arg6[%c0_10, %c0_11, %c0_12] : memref<1x128x128xf32, #tpu.memory_space<vmem>>, vector<1x128x128xf32>
    tpu.vector_store %arg6[%c0_10, %c0_11, %c0_12], %22 {strides = array<i32>} : memref<1x128x128xf32, #tpu.memory_space<vmem>>, vector<1x128x128xf32>,
    return
  }
  func.func @transform_0(%arg0: i32, %arg1: i32) -> (i32, i32, i32) {
    %c0_i32 = arith.constant 0 : i32
    %c0_i32_0 = arith.constant 0 : i32
    return %arg0, %arg1, %c0_i32 : i32, i32, i32
  }
  func.func @transform_1(%arg0: i32, %arg1: i32) -> (i32, i32, i32) {
    %c0_i32 = arith.constant 0 : i32
    %c0_i32_0 = arith.constant 0 : i32
    %c0_i32_1 = arith.constant 0 : i32
    return %arg0, %c0_i32, %c0_i32_0 : i32, i32, i32
  }
  func.func @transform_2(%arg0: i32, %arg1: i32) -> (i32, i32) {
    %c0_i32 = arith.constant 0 : i32
    %c0_i32_0 = arith.constant 0 : i32
    %c0_i32_1 = arith.constant 0 : i32
    return %c0_i32, %c0_i32_0 : i32, i32
  }
  func.func @transform_3(%arg0: i32, %arg1: i32) -> (i32, i32) {
    %c0_i32 = arith.constant 0 : i32
    %c0_i32_0 = arith.constant 0 : i32
    %c0_i32_1 = arith.constant 0 : i32
    return %c0_i32, %c0_i32_0 : i32, i32
  }
  func.func @transform_4(%arg0: i32, %arg1: i32) -> (i32, i32, i32) {
    %c0_i32 = arith.constant 0 : i32
    %c0_i32_0 = arith.constant 0 : i32
    return %arg0, %arg1, %c0_i32 : i32, i32, i32
  }
}

</mosaic_0001>

<bundles_post_ra>
// kernel: tpu_custom_call.1
= control target key start
LH: loop header
LB: loop body
LE: loop exit
PB: predicated region body
PF: predicated region fallthrough
CT: control target
= control target key end

     0   :  { %s2138_s0 = inlined_call_operand.hbm [shape: bf16[2,128,128], index: 0, kind: input, shape index: {}]   ;;  %s2139_s1 = inlined_call_operand.hbm [shape: f32[2,128,128], index: 1, kind: input, shape index: {}]   ;;  %s2140_s2 = inlined_call_operand.hbm [shape: bf16[128,128], index: 2, kind: input, shape index: {}]   ;;  %s2141_s3 = inlined_call_operand.vmem [shape: f32[1,128], index: 3, kind: input, shape index: {}]   ;;  %s2142_s4 = inlined_call_operand.hbm [shape: f32[2,128,128], index: 4, kind: output, shape index: {}]  }
   0x1   :  { %2149 = sst [smem:[#allocation18_spill]] %s2138_s0 }
   0x2   :  { %2150 = sst [smem:[#allocation19_spill]] %s2140_s2 }
   0x3   :  { %9 = vsyncpa [#allocation4], 0 }
   0x4   :  { %11 = vsyncpa [#allocation4 + $0x1], 0 }
   0x5   :  { %12 = vsyncpa [#allocation7], 0 }
   0x6   :  { %14 = vsyncpa [#allocation7 + $0x1], 0 }
   0x7   :  { %15 = vsyncpa [#allocation5], 0 }
   0x8   :  { %17 = vsyncpa [#allocation5 + $0x1], 0  ;;  %s1656_s15 = smov 0   ;;  %s1658_s16 = smov 0  }
   0x9   :  { %s1660_s17 = smov 0   ;;  %s1662_s18 = smov 0  }
   0xa   :  { %s1664_s19 = smov 0   ;;  %s1666_s20 = smov 0  }
   0xb LB: > { %2151 = sst [smem:[#allocation14_spill]] %s1610_s17  ;;  %s1687_s21 = sadd.s32 4294967295, %s1622_s20   ;;  %s1622_s20 = sphi %s1666_s20, %s23_s20   ;;  %s1618_s19 = sphi %s1664_s19, %s2172_s19   ;;  %s1614_s18 = sphi %s1662_s18, %s2171_s18   ;;  %s1610_s17 = sphi %s1660_s17, %s2167_s17   ;;  %s1606_s16 = sphi %s1658_s16, %s2170_s16   ;;  %s1602_s15 = sphi %s1656_s15, %s2169_s15  }
   0xc   : > { %2152 = sst [smem:[#allocation15_spill]] %s1622_s20  ;;  %s1088_s22 = sadd.s32 4294967294, %s1622_s20  }
   0xd   : > { %p57_p0 = scmp.ne.s32.totalorder %s1606_s16, %s1602_s15  ;;  %p58_p1 = scmp.eq.s32.totalorder %s1687_s21, 0 }
   0xe   : > { %p151_p2 = scmp.eq.s32.totalorder %s1687_s21, 1  ;;  %p157_p3 = scmp.eq.s32.totalorder %s1088_s22, 1 }
   0xf   : > { %p1696_p4 = por %p58_p1, %p57_p0  ;;  %p1089_p5 = scmp.ge.s32.totalorder %s1622_s20, 1 }
  0x10   : > { %p1701_p6 = por %p157_p3, %p57_p0  ;;  %p164_p7 = scmp.lt.s32.totalorder %s1622_s20, 3 }
  0x11   : > { %s2155_s2 = sld [smem:[#allocation19_spill]]  ;;  %s1624_s29 = smov [#allocation8]  }
  0x12   : > { %p1709_p8 = pnand %p1089_p5, %p164_p7  ;;  %s177_s30 = sshll.u32 %s1624_s29, 4  ;;  %s178_s30 = int_to_ptr.vmem [resolvable:$true] %s177_s30 }
  0x13   : > { %p1091_p11 = scmp.ge.s32.totalorder %s1622_s20, 2  ;;  %s2143_s5 = smov 64  }
  0x14   : > { %p1303_p9 = pneg %p1709_p8  ;;  %s2144_s6 = smov 4  }
  0x15   : > { %s35_s7 = sadd.s32 1, %s1618_s19  ;;  %s44_s8 = sadd.s32 1, %s1610_s17 }
  0x16   : > { %p1304_p10 = pnand %p1303_p9, %p58_p1  ;;  %p37_p12 = scmp.ge.s32.totalorder %s35_s7, 2 }
  0x17   : > { %s175_s27 = sshll.u32 %s2155_s2, 4  ;;  %p51_p13 = scmp.ne.s32.totalorder %s1610_s17, %s1606_s16  ;;  %s176_s27 = int_to_ptr.hbm [resolvable:$true] %s175_s27 }
  0x18   : > { %1306 = dma.hbm_to_vmem [thread:$0]  (!%p1304_p10), %s176_s27, 1024, %s178_s30, [#allocation7], %s2143_s5, %s2143_s5, %s2144_s6  }
  0x19   : > { %p52_p0 = scmp.eq.s32.totalorder %s1622_s20, 0  ;;  %s2174_s7 = smov (%p37_p12, %s35_s7), 0 }
  0x1a   : > { %2157 = sst [smem:[#allocation16_spill]] %s2174_s7  ;;  %p1734_p5 = por %p151_p2, %p51_p13 }
  0x1b   : > { %p1728_p3 = por %p52_p0, %p51_p13  ;;  %s39_s11 = ssub.s32 %s1618_s19, %s2174_s7 }
  0x1c   : > { %p1319_p7 = scmp.lt.s32.totalorder %s1622_s20, 2  ;;  %p42_p9 = scmp.eq.s32.totalorder %s39_s11, 0 }
  0x1d   : > { %s194_s12 = sand.u32 1, %s1610_s17   ;;  %s1172_s22 = sshll.u32 %s1618_s19, 6 }
  0x1e   : > { %s1092_s13 = sshll.u32 %s194_s12, 6  ;;  %s2161_s0 = sld [smem:[#allocation18_spill]] }
  0x1f   : > { %s1743_s14 = scalar_select %p42_p9, %s1610_s17, %s44_s8  }
  0x20   : > { %s198_s29 = scalar_lea.vmem [#allocation3], %s1092_s13  ;;  %p1751_p2 = pnand %p1319_p7, %p1728_p3 }
  0x21   : > { %2160 = sst [smem:[#allocation17_spill]] %s1743_s14  ;;  %s208_s30 = sshll.u32 %s198_s29, 4  ;;  %s209_s30 = int_to_ptr.vmem [resolvable:$true] %s208_s30 }
  0x22   : > { %s218_s11 = sand.u32 1, %s1622_s20   ;;  %s1095_s8 = sshll.u32 %s194_s12, 7 }
  0x23   : > { %s195_s2 = scalar_lea.sflag [#allocation4], %s194_s12  ;;  %s2163_s7 = smov 4  }
  0x24   : > { %s205_s27 = scalar_lea.hbm %s2161_s0, %s1172_s22  ;;  %s2164_s14 = smov 64  }
  0x25   : > { %s206_s5 = sshll.u32 %s205_s27, 4  ;;  %s1173_s13 = sshll.u32 %s1618_s19, 7  ;;  %s207_s5 = int_to_ptr.hbm [resolvable:$true] %s206_s5 }
  0x26   : > { %1310 = dma.hbm_to_vmem [thread:$0]  (!%p1751_p2), %s207_s5, 1024, %s209_s30, %s195_s2, %s2164_s14, %s2164_s14, %s2163_s7  }
  0x27   : > { %s227_s26 = scalar_lea.hbm %s2139_s1, %s1173_s13  ;;  %s222_s9 = scalar_lea.vmem [#allocation6], %s1095_s8 }
  0x28   : > { %s230_s27 = sshll.u32 %s222_s9, 4  ;;  %s228_s29 = sshll.u32 %s227_s26, 4  ;;  %s231_s27 = int_to_ptr.vmem [resolvable:$true] %s230_s27  ;;  %s229_s29 = int_to_ptr.hbm [resolvable:$true] %s228_s29 }
  0x29   : > { %s219_s0 = scalar_lea.sflag [#allocation7], %s218_s11  ;;  %s1627_s17 = smov 128  }
  0x2a   : > { %s1628_s20 = smov 8   ;;  %242 = sbr.rel (%p1709_p8) target bundleno = 589 (0x24d), region = 36 }
  0x2b   : > { %1313 = dma.hbm_to_vmem [thread:$0]  (!%p1751_p2), %s229_s29, 2048, %s231_s27, %s219_s0, %s1627_s17, %s1627_s17, %s1628_s20  }
  0x2c   : > { %s1770_s2 = sand.u32 (!%p1709_p8), 1, %s1606_s16  }
  0x2d   : > { %s1099_s5 = sshll.u32 (!%p1709_p8), %s1770_s2, 6  ;;  %s245_s7 = scalar_lea.sflag (!%p1709_p8), [#allocation4], %s1770_s2 }
  0x2e   : > { %s1774_s12 = scalar_lea.vmem (!%p1709_p8), [#allocation3], %s1099_s5 }
  0x2f   : > { %1585 = dma.done.wait (%p1696_p4), %s245_s7, 1024  }
  0x30   : > { %1587 = vsyncadd (%p1696_p4), %s245_s7, 4294966272  ;;  %s254_s0 = sand.u32 1, %s1687_s21   ;;  %s1100_s17 = sshll.u32 %s1770_s2, 7 }
  0x31   : > { %s255_s20 = scalar_lea.sflag [#allocation7], %s254_s0  ;;  %s1784_s28 = scalar_lea.vmem [#allocation6], %s1100_s17 }
  0x32   : > { %1589 = dma.done.wait (%p1696_p4), %s255_s20, 2048  }
  0x33   : > { %1591 = vsyncadd (%p1696_p4), %s255_s20, 4294965248 }
  0x34   : > { %1593 = dma.done.wait (%p58_p1), [#allocation7], 1024  }
  0x35   : > { %1595 = vsyncadd (%p58_p1), [#allocation7], 4294966272  ;;  %v1795_v0 = vld [vmem:[%s1774_s12 + $0x20] sm:$0xff]   ;;  %v1181_v2 = vld [vmem:[#allocation8 + $0x38] sm:$0xff]  ;;  %s2066_s6 = scalar_lea.vmem [#allocation9], %s1100_s17  ;;  %s1190_s14 = sshll.u32 %s1614_s18, 7 }
  0x36   : > { %v1798_v1 = vld [vmem:[%s1774_s12] sm:$0xff]   ;;  %v1249_v3 = vunpack.c.l.bf16 %v1795_v0  ;;  %1277 = vmatpush.bf16.msra.mxu2 %v1181_v2  ;;  %v1180_v5 = vld [vmem:[#allocation8 + $0x30] sm:$0xff]  ;;  %v1803_v6 = vld [vmem:[%s1774_s12 + $0x28] sm:$0xff]   ;;  %448 = vmatpush.bf16.msra.mxu0 %v1181_v2  ;;  %v1250_v9 = vunpack.c.h.bf16 %v1795_v0  ;;  %s962_s8 = scalar_lea.hbm %s2142_s4, %s1190_s14  ;;  %s963_s13 = sshll.u32 %s2066_s6, 4  ;;  %s964_s13 = int_to_ptr.vmem [resolvable:$true] %s963_s13 }
  0x37   : > { %v1233_v4 = vunpack.c.l.bf16 %v1798_v1  ;;  %v1253_v7 = vunpack.c.l.bf16 %v1803_v6  ;;  %v1179_v8 = vld [vmem:[#allocation8 + $0x28] sm:$0xff]  ;;  %v1234_v10 = vunpack.c.h.bf16 %v1798_v1  ;;  %v1254_v11 = vunpack.c.h.bf16 %v1803_v6  ;;  %v1178_v12 = vld [vmem:[#allocation8 + $0x20] sm:$0xff]  ;;  %v1177_v14 = vld [vmem:[#allocation8 + $0x18] sm:$0xff]  ;;  %s965_s22 = sshll.u32 %s962_s8, 4  ;;  %s949_s25 = scalar_lea.sflag [#allocation5], %s1770_s2  ;;  %s966_s22 = int_to_ptr.hbm [resolvable:$true] %s965_s22 }
  0x38   : > { %593 = vmax.xlane.f32.xlu0 %v1249_v3  ;;  %v1820_v13 = vld [vmem:[%s1774_s12 + $0x8] sm:$0xff]   ;;  %v1827_v17 = vld [vmem:[%s1774_s12 + $0x30] sm:$0xff]   ;;  %v1830_v19 = vld [vmem:[%s1784_s28 + $0x40] sm:$0xff]  ;;  %s1546_s26 = sshra.s32 %s966_s22, 4  ;;  %s1552_s29 = scalar_lea.hbm %s2142_s4, 256  ;;  %s1547_s26 = int_to_ptr.hbm [resolvable:$true] %s1546_s26 }
  0x39   : > { %577 = vmax.xlane.f32.xlu1 %v1233_v4  ;;  %597 = vmax.xlane.f32.xlu2 %v1253_v7  ;;  %v1237_v15 = vunpack.c.l.bf16 %v1820_v13  ;;  %v1238_v16 = vunpack.c.h.bf16 %v1820_v13  ;;  %v1176_v18 = vld [vmem:[#allocation8 + $0x10] sm:$0xff]  ;;  %v1257_v20 = vunpack.c.l.bf16 %v1827_v17  ;;  %v1834_v21 = vld [vmem:[%s1784_s28 + $0x48] sm:$0xff]  ;;  %v1837_v22 = vld [vmem:[%s1784_s28] sm:$0xff]  ;;  %v324_v25 = vpack.c.bf16 %v1830_v19, %v1830_v19  ;;  %s1548_s18 = scalar_lea.hbm %s1547_s26, 128  ;;  %p1553_p10 = scmp.lt.s32.totalorder %s1547_s26, %s2142_s4 }
  0x3a   : > { %1278 = vmatpush.bf16.msra.mxu2 %v1180_v5  ;;  %449 = vmatpush.bf16.msra.mxu0 %v1180_v5  ;;  %v1840_v23 = vld [vmem:[%s1784_s28 + $0x8] sm:$0xff]  ;;  %v1847_v24 = vld [vmem:[%s1774_s12 + $0x10] sm:$0xff]   ;;  %v325_v26 = vpack.c.bf16 %v1834_v21, %v1834_v21  ;;  %v316_v27 = vpack.c.bf16 %v1837_v22, %v1837_v22  ;;  %v1258_v30 = vunpack.c.h.bf16 %v1827_v17  ;;  %v1174_v37 = vld [vmem:[#allocation8] sm:$0xff]  ;;  %p1549_p1 = scmp.ne.s32.totalorder %s1547_s26, %s1548_s18  ;;  %p1554_p12 = scmp.lt.s32.totalorder %s1552_s29, %s1548_s18 }
  0x3b   : > { %v317_v28 = vpack.c.bf16 %v1840_v23, %v1840_v23  ;;  %v1175_v29 = vld [vmem:[#allocation8 + $0x8] sm:$0xff]  ;;  %v1241_v31 = vunpack.c.l.bf16 %v1847_v24  ;;  %v1242_v32 = vunpack.c.h.bf16 %v1847_v24  ;;  %v376_v33 = vunpack.c.l.b16 %v324_v25  ;;  %v1867_v38 = vld [vmem:[%s1774_s12 + $0x38] sm:$0xff]   ;;  %v1874_v43 = vld [vmem:[%s1784_s28 + $0x50] sm:$0xff] }
  0x3c   : > { %v377_v34 = vunpack.c.l.b16 %v325_v26  ;;  %v368_v35 = vunpack.c.l.b16 %v316_v27  ;;  %v1261_v41 = vunpack.c.l.bf16 %v1867_v38  ;;  %v1262_v42 = vunpack.c.h.bf16 %v1867_v38  ;;  %v1877_v44 = vld [vmem:[%s1784_s28 + $0x58] sm:$0xff]  ;;  %v1880_v45 = vld [vmem:[%s1784_s28 + $0x10] sm:$0xff]  ;;  %v1904_v59 = vld [vmem:[%s1784_s28 + $0x60] sm:$0xff]  ;;  %p1550_p4 = pnand %p1549_p1, %p1734_p5  ;;  %p1555_p13 = por %p1554_p12, %p1553_p10 }
  0x3d   : > { %v369_v36 = vunpack.c.l.b16 %v317_v28  ;;  %v1883_v46 = vld [vmem:[%s1784_s28 + $0x18] sm:$0xff]  ;;  %v326_v48 = vpack.c.bf16 %v1874_v43, %v1874_v43  ;;  %v327_v49 = vpack.c.bf16 %v1877_v44, %v1877_v44  ;;  %v318_v50 = vpack.c.bf16 %v1880_v45, %v1880_v45  ;;  %v1907_v60 = vld [vmem:[%s1784_s28 + $0x68] sm:$0xff]  ;;  %v1910_v61 = vld [vmem:[%s1784_s28 + $0x20] sm:$0xff] }
  0x3e   : > { %1279 = vmatpush.bf16.msra.mxu2 %v1179_v8  ;;  %450 = vmatpush.bf16.msra.mxu0 %v1179_v8  ;;  %v388_v39 = vpack.c.b16 %v377_v34, %v376_v33  ;;  %v1890_v47 = vld [vmem:[%s1774_s12 + $0x18] sm:$0xff]   ;;  %v319_v51 = vpack.c.bf16 %v1883_v46, %v1883_v46  ;;  %v1913_v62 = vld [vmem:[%s1784_s28 + $0x28] sm:$0xff]  ;;  %v328_v63 = vpack.c.bf16 %v1904_v59, %v1904_v59  ;;  %v1924_v28 = vld [vmem:[%s1784_s28 + $0x70] sm:$0xff]  ;;  %p1551_p8 = pneg %p1550_p4 }
  0x3f   : > { %v384_v40 = vpack.c.b16 %v369_v36, %v368_v35  ;;  %v1245_v52 = vunpack.c.l.bf16 %v1890_v47  ;;  %v378_v53 = vunpack.c.l.b16 %v326_v48  ;;  %v379_v54 = vunpack.c.l.b16 %v327_v49  ;;  %v1930_v33 = vld [vmem:[%s1784_s28 + $0x30] sm:$0xff]  ;;  %v1933_v34 = vld [vmem:[%s1784_s28 + $0x38] sm:$0xff]  ;;  %v2010_v38 = vld [vmem:[%s2141_s3] ss:$0 sm:$0xff] }
  0x40   : > { %595 = vmax.xlane.f32.xlu0 %v1250_v9  ;;  %v370_v55 = vunpack.c.l.b16 %v318_v50  ;;  %v371_v56 = vunpack.c.l.b16 %v319_v51  ;;  %v329_v2 = vpack.c.bf16 %v1907_v60, %v1907_v60  ;;  %v320_v5 = vpack.c.bf16 %v1910_v61, %v1910_v61  ;;  %p1556_p0 = pnand %p1555_p13, %p1551_p8 }
  0x41   : > { %579 = vmax.xlane.f32.xlu1 %v1234_v10  ;;  %599 = vmax.xlane.f32.xlu2 %v1254_v11  ;;  %v389_v57 = vpack.c.b16 %v379_v54, %v378_v53  ;;  %v321_v8 = vpack.c.bf16 %v1913_v62, %v1913_v62  ;;  %v330_v35 = vpack.c.bf16 %v1924_v28, %v1924_v28 }
  0x42   : > { %1280 = vmatpush.bf16.msra.mxu2 %v1178_v12  ;;  %451 = vmatpush.bf16.msra.mxu0 %v1178_v12  ;;  %v385_v58 = vpack.c.b16 %v371_v56, %v370_v55  ;;  %v380_v12 = vunpack.c.l.b16 %v328_v63 }
  0x43   : > { %v373_v25 = vunpack.c.l.b16 %v321_v8 }
  0x46   : > { %1281 = vmatpush.bf16.msra.mxu2 %v1177_v14  ;;  %452 = vmatpush.bf16.msra.mxu0 %v1177_v14  ;;  %v381_v14 = vunpack.c.l.b16 %v329_v2 }
  0x48   : > { %581 = vmax.xlane.f32.xlu0 %v1237_v15  ;;  %v390_v26 = vpack.c.b16 %v381_v14, %v380_v12 }
  0x49   : > { %583 = vmax.xlane.f32.xlu1 %v1238_v16  ;;  %601 = vmax.xlane.f32.xlu2 %v1257_v20 }
  0x4a   : > { %1282 = vmatpush.bf16.msra.mxu2 %v1176_v18  ;;  %453 = vmatpush.bf16.msra.mxu0 %v1176_v18  ;;  %v372_v18 = vunpack.c.l.b16 %v320_v5 }
  0x4c   : > { %v386_v27 = vpack.c.b16 %v373_v25, %v372_v18 }
  0x4e   : > { %1283 = vmatpush.bf16.msra.mxu2 %v1175_v29  ;;  %454 = vmatpush.bf16.msra.mxu0 %v1175_v29  ;;  %v1927_v29 = vld [vmem:[%s1784_s28 + $0x78] sm:$0xff] }
  0x4f   : > { %v331_v36 = vpack.c.bf16 %v1927_v29, %v1927_v29 }
  0x50   : > { %603 = vmax.xlane.f32.xlu0 %v1258_v30 }
  0x51   : > { %585 = vmax.xlane.f32.xlu1 %v1241_v31  ;;  %587 = vmax.xlane.f32.xlu2 %v1242_v32  ;;  %v383_v48 = vunpack.c.l.b16 %v331_v36 }
  0x52   : > { %1284 = vmatpush.bf16.msra.mxu2 %v1174_v37  ;;  %455 = vmatpush.bf16.msra.mxu0 %v1174_v37  ;;  %v322_v37 = vpack.c.bf16 %v1930_v33, %v1930_v33 }
  0x54   : > { %v374_v49 = vunpack.c.l.b16 %v322_v37 }
  0x55   : > { %476 = vmatmul.bf16.vlgmr.msra.gmra.mxu2 %v388_v39  ;;  %456 = vmatmul.bf16.vlgmr.msra.gmra.mxu0 %v384_v40  ;;  %v323_v39 = vpack.c.bf16 %v1933_v34, %v1933_v34  ;;  %v382_v40 = vunpack.c.l.b16 %v330_v35 }
  0x57   : > { %v375_v50 = vunpack.c.l.b16 %v323_v39  ;;  %v391_v51 = vpack.c.b16 %v383_v48, %v382_v40 }
  0x58   : > { %605 = vmax.xlane.f32.xlu0 %v1261_v41 }
  0x59   : > { %607 = vmax.xlane.f32.xlu1 %v1262_v42  ;;  %v387_v53 = vpack.c.b16 %v375_v50, %v374_v49 }
  0x61   : > { %589 = vmax.xlane.f32.xlu1 %v1245_v52 }
  0x65   : > { %481 = vmatmul.bf16.gmra.mxu2 %v389_v57  ;;  %461 = vmatmul.bf16.gmra.mxu0 %v385_v58 }
  0x75   : > { %486 = vmatmul.bf16.gmra.mxu2 %v390_v26  ;;  %466 = vmatmul.bf16.gmra.mxu0 %v386_v27 }
  0x85   : > { %491 = vmatmul.bf16.gmra.mxu2 %v391_v51  ;;  %471 = vmatmul.bf16.gmra.mxu0 %v387_v53 }
  0xab   : > { %v594_v54 = vpop.xlane.xlu0 %593 }
  0xac   : > { %v578_v55 = vpop.xlane.xlu1 %577  ;;  %v617_v56 = vsub.f32 %v1249_v3, %v594_v54  ;;  %v598_v57 = vpop.xlane.xlu2 %597 }
  0xad   : > { %v609_v12 = vsub.f32 %v1233_v4, %v578_v55  ;;  %v619_v3 = vsub.f32 %v1253_v7, %v598_v57 }
  0xae   : > { %v641_v58 = vmul.f32 1.442695, %v617_v56 }
  0xaf   : > { %v625_v27 = vmul.f32 1.442695, %v609_v12  ;;  %v645_v0 = vmul.f32 1.442695, %v619_v3 }
  0xb0   : > { %1378 = vpow2.f32 %v641_v58 }
  0xb3   : > { %v596_v63 = vpop.xlane.xlu0 %595 }
  0xb4   : > { %v580_v2 = vpop.xlane.xlu1 %579  ;;  %v618_v5 = vsub.f32 %v1250_v9, %v596_v63  ;;  %v600_v26 = vpop.xlane.xlu2 %599 }
  0xb5   : > { %v610_v8 = vsub.f32 %v1234_v10, %v580_v2  ;;  %v1246_v10 = vunpack.c.h.bf16 %v1890_v47  ;;  %v620_v4 = vsub.f32 %v1254_v11, %v600_v26 }
  0xb6   : > { %v1951_v14 = vpop.eup %1378  ;;  %v643_v18 = vmul.f32 1.442695, %v618_v5 }
  0xb7   : > { %v627_v25 = vmul.f32 1.442695, %v610_v8  ;;  %673 = vadd.xlane.f32.xlu2 %v1951_v14  ;;  %v647_v6 = vmul.f32 1.442695, %v620_v4 }
  0xb8   : > { %1380 = vpow2.f32 %v643_v18 }
  0xb9   : > { %1382 = vpow2.f32 %v627_v25 }
  0xba   : > { %1384 = vpow2.f32 %v625_v27 }
  0xbb   : > { %v582_v9 = vpop.xlane.xlu0 %581  ;;  %1386 = vpow2.f32 %v645_v0 }
  0xbc   : > { %v584_v35 = vpop.xlane.xlu1 %583  ;;  %v611_v1 = vsub.f32 %v1237_v15, %v582_v9  ;;  %v602_v15 = vpop.xlane.xlu2 %601 }
  0xbd   : > { %v612_v37 = vsub.f32 %v1238_v16, %v584_v35  ;;  %v621_v16 = vsub.f32 %v1257_v20, %v602_v15 }
  0xbe   : > { %v1961_v36 = vpop.eup %1380  ;;  %v629_v7 = vmul.f32 1.442695, %v611_v1 }
  0xbf   : > { %v1965_v39 = vpop.eup %1382  ;;  %591 = vmax.xlane.f32.xlu2 %v1246_v10  ;;  %675 = vadd.xlane.f32.xlu0 %v1961_v36  ;;  %v631_v11 = vmul.f32 1.442695, %v612_v37  ;;  %v649_v55 = vmul.f32 1.442695, %v621_v16 }
  0xc0   : > { %1388 = vpow2.f32 %v629_v7  ;;  %659 = vadd.xlane.f32.xlu1 %v1965_v39  ;;  %v1971_v40 = vpop.eup %1384 }
  0xc1   : > { %v1973_v50 = vpop.eup %1386  ;;  %1390 = vpow2.f32 %v647_v6 }
  0xc2   : > { %1392 = vpow2.f32 %v631_v11 }
  0xc3   : > { %v604_v48 = vpop.xlane.xlu0 %603 }
  0xc4   : > { %v586_v49 = vpop.xlane.xlu1 %585  ;;  %v622_v13 = vsub.f32 %v1258_v30, %v604_v48  ;;  %v588_v56 = vpop.xlane.xlu2 %587 }
  0xc5   : > { %v613_v54 = vsub.f32 %v1241_v31, %v586_v49  ;;  %v614_v31 = vsub.f32 %v1242_v32, %v588_v56 }
  0xc6   : > { %v1979_v51 = vpop.eup %1388  ;;  %v651_v53 = vmul.f32 1.442695, %v622_v13 }
  0xc7   : > { %677 = vadd.xlane.f32.xlu2 %v1973_v50  ;;  %657 = vadd.xlane.f32.xlu0 %v1971_v40  ;;  %v633_v30 = vmul.f32 1.442695, %v613_v54  ;;  %v1986_v57 = vpop.eup %1390  ;;  %v635_v12 = vmul.f32 1.442695, %v614_v31 }
  0xc8   : > { %1394 = vpow2.f32 %v651_v53  ;;  %661 = vadd.xlane.f32.xlu1 %v1979_v51  ;;  %v1988_v58 = vpop.eup %1392 }
  0xc9   : > { %1396 = vpow2.f32 %v649_v55 }
  0xca   : > { %1398 = vpow2.f32 %v633_v30 }
  0xcb   : > { %v606_v17 = vpop.xlane.xlu0 %605 }
  0xcc   : > { %v608_v20 = vpop.xlane.xlu1 %607  ;;  %v623_v63 = vsub.f32 %v1261_v41, %v606_v17 }
  0xcd   : > { %v624_v8 = vsub.f32 %v1262_v42, %v608_v20 }
  0xce   : > { %v1994_v2 = vpop.eup %1394  ;;  %v653_v5 = vmul.f32 1.442695, %v623_v63 }
  0xcf   : > { %679 = vadd.xlane.f32.xlu0 %v1986_v57  ;;  %663 = vadd.xlane.f32.xlu2 %v1988_v58  ;;  %v655_v41 = vmul.f32 1.442695, %v624_v8  ;;  %v2001_v18 = vpop.eup %1396 }
  0xd0   : > { %1400 = vpow2.f32 %v653_v5  ;;  %683 = vadd.xlane.f32.xlu1 %v1994_v2  ;;  %v2003_v25 = vpop.eup %1398 }
  0xd1   : > { %1402 = vpow2.f32 %v635_v12 }
  0xd2   : > { %v457_v32 = vpop.f32.mrf.mxu0  ;;  %1404 = vpow2.f32 %v655_v41 }
  0xd3   : > { %v458_v26 = vadd.f32 %v2010_v38, %v457_v32 }
  0xd4   : > { %v590_v24 = vpop.xlane.xlu1 %589 }
  0xd5   : > { %v615_v42 = vsub.f32 %v1245_v52, %v590_v24  ;;  %v497_v4 = vmax.f32 %v458_v26, 0.0 }
  0xd6   : > { %v2005_v3 = vpop.eup %1400 }
  0xd7   : > { %681 = vadd.xlane.f32.xlu0 %v2001_v18  ;;  %665 = vadd.xlane.f32.xlu2 %v2003_v25  ;;  %v637_v0 = vmul.f32 1.442695, %v615_v42  ;;  %v2018_v9 = vpop.eup %1402 }
  0xd8   : > { %685 = vadd.xlane.f32.xlu1 %v2005_v3  ;;  %v477_v27 = vpop.f32.mrf.mxu2  ;;  %v2020_v1 = vpop.eup %1404 }
  0xd9   : > { %v478_v52 = vadd.f32 %v2010_v38, %v477_v27  ;;  %1406 = vpow2.f32 %v637_v0 }
  0xda   : > { %v459_v35 = vpop.f32.mrf.mxu0 }
  0xdb   : > { %v460_v7 = vadd.f32 %v2010_v38, %v459_v35  ;;  %v505_v11 = vmax.f32 %v478_v52, 0.0 }
  0xdd   : > { %v498_v37 = vmax.f32 %v460_v7, 0.0 }
  0xdf   : > { %667 = vadd.xlane.f32.xlu0 %v2018_v9  ;;  %687 = vadd.xlane.f32.xlu2 %v2020_v1  ;;  %v1194_v15 = vpack.c.bf16 %v498_v37, %v497_v4  ;;  %v2027_v13 = vpop.eup %1406 }
  0xe0   : > { %v479_v6 = vpop.f32.mrf.mxu2 }
  0xe1   : > { %v480_v48 = vadd.f32 %v2010_v38, %v479_v6  ;;  %1195 = vst [vmem:[#allocation2 + $0x30] sm:$0xff] %v1194_v15  }
  0xe2   : > { %v462_v49 = vpop.f32.mrf.mxu0 }
  0xe3   : > { %v506_v16 = vmax.f32 %v480_v48, 0.0  ;;  %v463_v54 = vadd.f32 %v2010_v38, %v462_v49 }
  0xe5   : > { %v1214_v53 = vpack.c.bf16 %v506_v16, %v505_v11  ;;  %v499_v56 = vmax.f32 %v463_v54, 0.0 }
  0xe7   : > { %669 = vadd.xlane.f32.xlu0 %v2027_v13  ;;  %1266 = vst [vmem:[#allocation2 + $0x8] sm:$0xff] %v1214_v53  }
  0xe8   : > { %v482_v55 = vpop.f32.mrf.mxu2 }
  0xe9   : > { %v483_v20 = vadd.f32 %v2010_v38, %v482_v55 }
  0xea   : > { %v464_v30 = vpop.f32.mrf.mxu0 }
  0xeb   : > { %v465_v17 = vadd.f32 %v2010_v38, %v464_v30  ;;  %v507_v8 = vmax.f32 %v483_v20, 0.0 }
  0xed   : > { %v500_v63 = vmax.f32 %v465_v17, 0.0 }
  0xef   : > { %v1199_v31 = vpack.c.bf16 %v500_v63, %v499_v56 }
  0xf0   : > { %v484_v5 = vpop.f32.mrf.mxu2 }
  0xf1   : > { %v485_v12 = vadd.f32 %v2010_v38, %v484_v5  ;;  %1263 = vst [vmem:[#allocation2] sm:$0xff] %v1199_v31  }
  0xf2   : > { %v467_v41 = vpop.f32.mrf.mxu0 }
  0xf3   : > { %v508_v24 = vmax.f32 %v485_v12, 0.0  ;;  %v468_v42 = vadd.f32 %v2010_v38, %v467_v41 }
  0xf5   : > { %v1219_v32 = vpack.c.bf16 %v508_v24, %v507_v8  ;;  %v501_v0 = vmax.f32 %v468_v42, 0.0  ;;  %v1186_v42 = vld [vmem:[#allocation2 + $0x8] sm:$0xff] }
  0xf7   : > { %1267 = vst [vmem:[#allocation2 + $0x20] sm:$0xff] %v1219_v32  }
  0xf8   : > { %v487_v26 = vpop.f32.mrf.mxu2 }
  0xf9   : > { %v488_v4 = vadd.f32 %v2010_v38, %v487_v26 }
  0xfa   : > { %v469_v27 = vpop.f32.mrf.mxu0 }
  0xfb   : > { %v470_v35 = vadd.f32 %v2010_v38, %v469_v27  ;;  %v509_v15 = vmax.f32 %v488_v4, 0.0 }
  0xfd   : > { %v502_v7 = vmax.f32 %v470_v35, 0.0 }
  0xfe   : > { %v1187_v32 = vld [vmem:[#allocation2 + $0x20] sm:$0xff] }
  0xff   : > { %v1204_v52 = vpack.c.bf16 %v502_v7, %v501_v0 }
 0x100   : > { %v489_v37 = vpop.f32.mrf.mxu2 }
 0x101   : > { %v490_v6 = vadd.f32 %v2010_v38, %v489_v37  ;;  %1264 = vst [vmem:[#allocation2 + $0x18] sm:$0xff] %v1204_v52  }
 0x102   : > { %v472_v11 = vpop.f32.mrf.mxu0 }
 0x103   : > { %v510_v48 = vmax.f32 %v490_v6, 0.0  ;;  %v473_v16 = vadd.f32 %v2010_v38, %v472_v11 }
 0x105   : > { %v1224_v49 = vpack.c.bf16 %v510_v48, %v509_v15  ;;  %v503_v55 = vmax.f32 %v473_v16, 0.0  ;;  %v1183_v15 = vld [vmem:[#allocation2] sm:$0xff]  ;;  %v1182_v48 = vld [vmem:[#allocation2 + $0x30] sm:$0xff] }
 0x107   : > { %1268 = vst [vmem:[#allocation2 + $0x28] sm:$0xff] %v1224_v49  }
 0x108   : > { %v492_v53 = vpop.f32.mrf.mxu2 }
 0x109   : > { %v493_v56 = vadd.f32 %v2010_v38, %v492_v53 }
 0x10a   : > { %v474_v54 = vpop.f32.mrf.mxu0 }
 0x10b   : > { %v475_v30 = vadd.f32 %v2010_v38, %v474_v54  ;;  %v511_v31 = vmax.f32 %v493_v56, 0.0 }
 0x10d   : > { %v504_v17 = vmax.f32 %v475_v30, 0.0 }
 0x10e   : > { %v1188_v24 = vld [vmem:[#allocation2 + $0x28] sm:$0xff] }
 0x10f   : > { %v1209_v20 = vpack.c.bf16 %v504_v17, %v503_v55 }
 0x110   : > { %v494_v63 = vpop.f32.mrf.mxu2 }
 0x111   : > { %v495_v5 = vadd.f32 %v2010_v38, %v494_v63  ;;  %1265 = vst [vmem:[#allocation2 + $0x10] sm:$0xff] %v1209_v20   ;;  %v1184_v38 = vld [vmem:[#allocation2 + $0x18] sm:$0xff] }
 0x113   : > { %v512_v8 = vmax.f32 %v495_v5, 0.0 }
 0x115   : > { %v1229_v12 = vpack.c.bf16 %v512_v8, %v511_v31 }
 0x117   : > { %1269 = vst [vmem:[#allocation2 + $0x38] sm:$0xff] %v1229_v12  }
 0x118   : > { %v1185_v27 = vld [vmem:[#allocation2 + $0x10] sm:$0xff] }
 0x11e   : > { %v1189_v41 = vld [vmem:[#allocation2 + $0x38] sm:$0xff] }
 0x11f   : > { %1285 = vmatpush.bf16.msra.mxu3 %v1189_v41  ;;  %849 = vmatpush.bf16.msra.mxu1 %v1189_v41 }
 0x123   : > { %1286 = vmatpush.bf16.msra.mxu3 %v1188_v24  ;;  %850 = vmatpush.bf16.msra.mxu1 %v1188_v24 }
 0x127   : > { %1287 = vmatpush.bf16.msra.mxu3 %v1187_v32  ;;  %851 = vmatpush.bf16.msra.mxu1 %v1187_v32 }
 0x12a   : > { %v674_v26 = vpop.xlane.xlu2 %673 }
 0x12b   : > { %1408 = vrcp.f32 %v674_v26  ;;  %1288 = vmatpush.bf16.msra.mxu3 %v1186_v42  ;;  %852 = vmatpush.bf16.msra.mxu1 %v1186_v42 }
 0x12f   : > { %1289 = vmatpush.bf16.msra.mxu3 %v1185_v27  ;;  %853 = vmatpush.bf16.msra.mxu1 %v1185_v27 }
 0x131   : > { %v1409_v4 = vpop.eup %1408 }
 0x132   : > { %v592_v0 = vpop.xlane.xlu2 %591  ;;  %v676_v35 = vpop.xlane.xlu0 %675  ;;  %v713_v6 = vmul.f32 %v1409_v4, %v1951_v14 }
 0x133   : > { %v616_v7 = vsub.f32 %v1246_v10, %v592_v0  ;;  %1410 = vrcp.f32 %v676_v35  ;;  %v660_v52 = vpop.xlane.xlu1 %659  ;;  %1290 = vmatpush.bf16.msra.mxu3 %v1184_v38  ;;  %854 = vmatpush.bf16.msra.mxu1 %v1184_v38 }
 0x134   : > { %1412 = vrcp.f32 %v660_v52  ;;  %v729_v47 = vpack.c.bf16 %v713_v6, %v713_v6 }
 0x135   : > { %v639_v37 = vmul.f32 1.442695, %v616_v7 }
 0x136   : > { %v777_v14 = vunpack.c.l.b16 %v729_v47 }
 0x137   : > { %1414 = vpow2.f32 %v639_v37  ;;  %1291 = vmatpush.bf16.msra.mxu3 %v1183_v15  ;;  %855 = vmatpush.bf16.msra.mxu1 %v1183_v15 }
 0x139   : > { %v1411_v11 = vpop.eup %1410 }
 0x13a   : > { %v678_v49 = vpop.xlane.xlu2 %677  ;;  %v658_v16 = vpop.xlane.xlu0 %657  ;;  %v714_v53 = vmul.f32 %v1411_v11, %v1961_v36 }
 0x13b   : > { %v1413_v10 = vpop.eup %1412  ;;  %1416 = vrcp.f32 %v658_v16  ;;  %1292 = vmatpush.bf16.msra.mxu3 %v1182_v48  ;;  %856 = vmatpush.bf16.msra.mxu1 %v1182_v48  ;;  %v662_v17 = vpop.xlane.xlu1 %661 }
 0x13c   : > { %v730_v54 = vpack.c.bf16 %v714_v53, %v714_v53  ;;  %1418 = vrcp.f32 %v678_v49  ;;  %v706_v56 = vmul.f32 %v1413_v10, %v1965_v39 }
 0x13d   : > { %v2046_v55 = vpop.eup %1414 }
 0x13e   : > { %671 = vadd.xlane.f32.xlu1 %v2046_v55  ;;  %v778_v30 = vunpack.c.l.b16 %v730_v54  ;;  %v722_v12 = vpack.c.bf16 %v706_v56, %v706_v56 }
 0x140   : > { %v789_v20 = vpack.c.b16 %v778_v30, %v777_v14  ;;  %v770_v42 = vunpack.c.l.b16 %v722_v12 }
 0x141   : > { %v1417_v63 = vpop.eup %1416 }
 0x142   : > { %v680_v31 = vpop.xlane.xlu0 %679  ;;  %v664_v36 = vpop.xlane.xlu2 %663  ;;  %877 = vmatmul.bf16.vlgmr.msra.gmra.mxu3 %v789_v20  ;;  %v705_v8 = vmul.f32 %v1417_v63, %v1971_v40 }
 0x143   : > { %v1419_v5 = vpop.eup %1418  ;;  %1420 = vrcp.f32 %v680_v31  ;;  %v684_v38 = vpop.xlane.xlu1 %683 }
 0x144   : > { %1422 = vrcp.f32 %v664_v36  ;;  %v721_v41 = vpack.c.bf16 %v705_v8, %v705_v8  ;;  %v715_v24 = vmul.f32 %v1419_v5, %v1973_v50 }
 0x145   : > { %1424 = vrcp.f32 %v662_v17 }
 0x146   : > { %v769_v32 = vunpack.c.l.b16 %v721_v41  ;;  %v731_v4 = vpack.c.bf16 %v715_v24, %v715_v24 }
 0x148   : > { %v785_v39 = vpack.c.b16 %v770_v42, %v769_v32  ;;  %v779_v15 = vunpack.c.l.b16 %v731_v4 }
 0x149   : > { %v1421_v26 = vpop.eup %1420 }
 0x14a   : > { %v1423_v27 = vpop.eup %1422  ;;  %v682_v0 = vpop.xlane.xlu0 %681  ;;  %v716_v35 = vmul.f32 %v1421_v26, %v1986_v57  ;;  %857 = vmatmul.bf16.vlgmr.msra.gmra.mxu1 %v785_v39 }
 0x14b   : > { %1426 = vrcp.f32 %v682_v0  ;;  %v1425_v7 = vpop.eup %1424  ;;  %v708_v52 = vmul.f32 %v1423_v27, %v1988_v58  ;;  %v666_v37 = vpop.xlane.xlu2 %665 }
 0x14c   : > { %v732_v40 = vpack.c.bf16 %v716_v35, %v716_v35  ;;  %1428 = vrcp.f32 %v684_v38  ;;  %v707_v6 = vmul.f32 %v1425_v7, %v1979_v51  ;;  %v686_v51 = vpop.xlane.xlu1 %685 }
 0x14d   : > { %v724_v49 = vpack.c.bf16 %v708_v52, %v708_v52 }
 0x14e   : > { %v780_v50 = vunpack.c.l.b16 %v732_v40  ;;  %v723_v57 = vpack.c.bf16 %v707_v6, %v707_v6 }
 0x14f   : > { %v772_v10 = vunpack.c.l.b16 %v724_v49 }
 0x150   : > { %v790_v11 = vpack.c.b16 %v780_v50, %v779_v15  ;;  %v771_v58 = vunpack.c.l.b16 %v723_v57 }
 0x151   : > { %v1427_v48 = vpop.eup %1426 }
 0x152   : > { %v668_v16 = vpop.xlane.xlu0 %667  ;;  %882 = vmatmul.bf16.gmra.mxu3 %v790_v11  ;;  %v1429_v53 = vpop.eup %1428  ;;  %v717_v47 = vmul.f32 %v1427_v48, %v2001_v18  ;;  %v786_v56 = vpack.c.b16 %v772_v10, %v771_v58 }
 0x153   : > { %1430 = vrcp.f32 %v668_v16  ;;  %v718_v54 = vmul.f32 %v1429_v53, %v1994_v2  ;;  %v688_v14 = vpop.xlane.xlu2 %687 }
 0x154   : > { %1432 = vrcp.f32 %v666_v37  ;;  %v733_v30 = vpack.c.bf16 %v717_v47, %v717_v47 }
 0x155   : > { %v734_v20 = vpack.c.bf16 %v718_v54, %v718_v54  ;;  %1434 = vrcp.f32 %v688_v14 }
 0x156   : > { %v781_v31 = vunpack.c.l.b16 %v733_v30  ;;  %1436 = vrcp.f32 %v686_v51 }
 0x157   : > { %v782_v5 = vunpack.c.l.b16 %v734_v20 }
 0x159   : > { %v1431_v17 = vpop.eup %1430  ;;  %v791_v8 = vpack.c.b16 %v782_v5, %v781_v31 }
 0x15a   : > { %862 = vmatmul.bf16.gmra.mxu1 %v786_v56  ;;  %v1433_v63 = vpop.eup %1432  ;;  %v710_v36 = vmul.f32 %v1431_v17, %v2018_v9 }
 0x15b   : > { %v709_v18 = vmul.f32 %v1433_v63, %v2003_v25  ;;  %v1435_v12 = vpop.eup %1434  ;;  %v670_v25 = vpop.xlane.xlu0 %669 }
 0x15c   : > { %v726_v2 = vpack.c.bf16 %v710_v36, %v710_v36  ;;  %v1437_v41 = vpop.eup %1436  ;;  %v720_v32 = vmul.f32 %v1435_v12, %v2020_v1  ;;  %1438 = vrcp.f32 %v670_v25 }
 0x15d   : > { %v725_v24 = vpack.c.bf16 %v709_v18, %v709_v18  ;;  %v719_v26 = vmul.f32 %v1437_v41, %v2005_v3 }
 0x15e   : > { %v774_v42 = vunpack.c.l.b16 %v726_v2  ;;  %v736_v27 = vpack.c.bf16 %v720_v32, %v720_v32 }
 0x15f   : > { %v773_v39 = vunpack.c.l.b16 %v725_v24  ;;  %v735_v0 = vpack.c.bf16 %v719_v26, %v719_v26 }
 0x160   : > { %v784_v9 = vunpack.c.l.b16 %v736_v27 }
 0x161   : > { %v787_v38 = vpack.c.b16 %v774_v42, %v773_v39  ;;  %v783_v35 = vunpack.c.l.b16 %v735_v0 }
 0x162   : > { %887 = vmatmul.bf16.gmra.mxu3 %v791_v8  ;;  %v1439_v40 = vpop.eup %1438 }
 0x163   : > { %v792_v4 = vpack.c.b16 %v784_v9, %v783_v35  ;;  %v711_v1 = vmul.f32 %v1439_v40, %v2027_v13 }
 0x165   : > { %v727_v37 = vpack.c.bf16 %v711_v1, %v711_v1 }
 0x167   : > { %v775_v50 = vunpack.c.l.b16 %v727_v37 }
 0x16a   : > { %867 = vmatmul.bf16.gmra.mxu1 %v787_v38 }
 0x172   : > { %892 = vmatmul.bf16.gmra.mxu3 %v792_v4 }
 0x1b1   : > { %v672_v7 = vpop.xlane.xlu1 %671 }
 0x1b2   : > { %1440 = vrcp.f32 %v672_v7 }
 0x1b8   : > { %v1441_v52 = vpop.eup %1440 }
 0x1b9   : > { %v712_v3 = vmul.f32 %v1441_v52, %v2046_v55 }
 0x1bb   : > { %v728_v15 = vpack.c.bf16 %v712_v3, %v712_v3 }
 0x1bd   : > { %v776_v6 = vunpack.c.l.b16 %v728_v15 }
 0x1bf   : > { %v788_v11 = vpack.c.b16 %v776_v6, %v775_v50 }
 0x1c1   : > { %872 = vmatmul.bf16.gmra.mxu1 %v788_v11 }
 0x1c5   : > { %v878_v48 = vpop.f32.mrf.mxu3 }
 0x1c6   : > { %v924_v49 = vadd.f32 %v878_v48, %v1830_v19 }
 0x1c7   : > { %v858_v13 = vpop.f32.mrf.mxu1 }
 0x1c8   : > { %940 = vst [vmem:[%s2066_s6 + $0x40] sm:$0xff] %v924_v49  ;;  %v916_v55 = vadd.f32 %v858_v13, %v1837_v22 }
 0x1ca   : > { %932 = vst [vmem:[%s2066_s6] sm:$0xff] %v916_v55 }
 0x1cd   : > { %v880_v16 = vpop.f32.mrf.mxu3 }
 0x1ce   : > { %v925_v53 = vadd.f32 %v880_v16, %v1834_v21 }
 0x1cf   : > { %v860_v19 = vpop.f32.mrf.mxu1 }
 0x1d0   : > { %941 = vst [vmem:[%s2066_s6 + $0x48] sm:$0xff] %v925_v53  ;;  %v917_v57 = vadd.f32 %v860_v19, %v1840_v23 }
 0x1d2   : > { %933 = vst [vmem:[%s2066_s6 + $0x8] sm:$0xff] %v917_v57 }
 0x1d5   : > { %v883_v47 = vpop.f32.mrf.mxu3 }
 0x1d6   : > { %v926_v10 = vadd.f32 %v883_v47, %v1874_v43 }
 0x1d7   : > { %v863_v54 = vpop.f32.mrf.mxu1 }
 0x1d8   : > { %942 = vst [vmem:[%s2066_s6 + $0x50] sm:$0xff] %v926_v10  ;;  %v918_v22 = vadd.f32 %v863_v54, %v1880_v45 }
 0x1da   : > { %934 = vst [vmem:[%s2066_s6 + $0x10] sm:$0xff] %v918_v22 }
 0x1dd   : > { %v885_v58 = vpop.f32.mrf.mxu3 }
 0x1de   : > { %v927_v21 = vadd.f32 %v885_v58, %v1877_v44 }
 0x1df   : > { %v865_v14 = vpop.f32.mrf.mxu1 }
 0x1e0   : > { %943 = vst [vmem:[%s2066_s6 + $0x58] sm:$0xff] %v927_v21  ;;  %v919_v23 = vadd.f32 %v865_v14, %v1883_v46 }
 0x1e2   : > { %935 = vst [vmem:[%s2066_s6 + $0x18] sm:$0xff] %v919_v23 }
 0x1e5   : > { %v888_v30 = vpop.f32.mrf.mxu3 }
 0x1e6   : > { %v928_v43 = vadd.f32 %v888_v30, %v1904_v59 }
 0x1e7   : > { %v868_v56 = vpop.f32.mrf.mxu1 }
 0x1e8   : > { %944 = vst [vmem:[%s2066_s6 + $0x60] sm:$0xff] %v928_v43  ;;  %v920_v45 = vadd.f32 %v868_v56, %v1910_v61 }
 0x1ea   : > { %936 = vst [vmem:[%s2066_s6 + $0x20] sm:$0xff] %v920_v45 }
 0x1ed   : > { %v890_v17 = vpop.f32.mrf.mxu3 }
 0x1ee   : > { %v929_v44 = vadd.f32 %v890_v17, %v1907_v60 }
 0x1ef   : > { %v870_v51 = vpop.f32.mrf.mxu1 }
 0x1f0   : > { %945 = vst [vmem:[%s2066_s6 + $0x68] sm:$0xff] %v929_v44  ;;  %v921_v46 = vadd.f32 %v870_v51, %v1913_v62 }
 0x1f2   : > { %937 = vst [vmem:[%s2066_s6 + $0x28] sm:$0xff] %v921_v46 }
 0x1f5   : > { %v893_v20 = vpop.f32.mrf.mxu3 }
 0x1f6   : > { %v930_v59 = vadd.f32 %v893_v20, %v1924_v28 }
 0x1f8   : > { %946 = vst [vmem:[%s2066_s6 + $0x70] sm:$0xff] %v930_v59 }
 0x1fd   : > { %v895_v63 = vpop.f32.mrf.mxu3 }
 0x1fe   : > { %v931_v61 = vadd.f32 %v895_v63, %v1927_v29 }
 0x200   : > { %947 = vst [vmem:[%s2066_s6 + $0x78] sm:$0xff] %v931_v61 }
 0x23e   : > { %v873_v31 = vpop.f32.mrf.mxu1 }
 0x23f   : > { %v922_v60 = vadd.f32 %v873_v31, %v1930_v33 }
 0x241   : > { %938 = vst [vmem:[%s2066_s6 + $0x30] sm:$0xff] %v922_v60 }
 0x246   : > { %v875_v62 = vpop.f32.mrf.mxu1 }
 0x247   : > { %v923_v28 = vadd.f32 %v875_v62, %v1933_v34 }
 0x249   : > { %939 = vst [vmem:[%s2066_s6 + $0x38] sm:$0xff] %v923_v28 }
 0x24a   : > { %1559 = shalt.err (!%p1556_p0)
}
 0x24b   : > { %s1629_s2 = smov 128   ;;  %s1630_s12 = smov 8  }
 0x24c   : > { %1301 = dma.vmem_to_hbm [thread:$0]  (%p1734_p5), %s964_s13, 2048, %s966_s22, %s949_s25, %s1629_s2, %s1629_s2, %s1630_s12  }
 0x24d PF: > { %s2165_s0 = sld [smem:[#allocation15_spill]]  ;;  %s980_s17 = sand.u32 1, %s1602_s15  }
 0x24e   : > { %p1315_p3 = pnand %p1091_p11, %p1701_p6  ;;  %s981_s20 = scalar_lea.sflag [#allocation5], %s980_s17 }
 0x250   : > { %p1316_p7 = pneg %p1315_p3 }
 0x252   : > { %1597 = dma.done.wait (%p1316_p7), %s981_s20, 2048  }
 0x253   : > { %1599 = vsyncadd (%p1316_p7), %s981_s20, 4294965248  ;;  %s23_s20 = sadd.s32 1, %s2165_s0   ;;  %s2166_s28 = sld [smem:[#allocation14_spill]] }
 0x254   : > { %p20_p9 = scmp.ge.s32.totalorder %s23_s20, 4   ;;  %s2167_s17 = sld [smem:[#allocation17_spill]] }
 0x255   : > { %s2168_s10 = sld [smem:[#allocation16_spill]]  ;;  %s2169_s15 = smov %s1606_s16 }
 0x256   : > { %s2171_s18 = smov %s1618_s19 }
 0x257   :  { %22 = sbr.rel (!%p20_p9) target bundleno = 11 (0xb), region = 103 }
 0x259   : > { %s2170_s16 = smov %s2166_s28 }
 0x25b   : > { %s2172_s19 = smov %s2168_s10 }
 0x25c   :  { %987 = vsyncpa [#allocation4], 1 }
 0x25d   :  { %989 = vsyncpa [#allocation4 + $0x1], 1 }
 0x25e   :  { %990 = vsyncpa [#allocation7], 1 }
 0x25f   :  { %992 = vsyncpa [#allocation7 + $0x1], 1 }
 0x260   :  { %993 = vsyncpa [#allocation5], 1 }
 0x261   :  { %995 = vsyncpa [#allocation5 + $0x1], 1 }

</bundles_post_ra>
